<compile_context>
chip_gen: v7x
topology: tpu7x:2x2x1
jax: 0.10.0
libtpu: 0.0.40
codegen_flags: <defaults>
</compile_context>

<pallas_src>
import jax
import jax.numpy as jnp
from jax.experimental import pallas as pl
from jax.experimental.pallas import tpu as pltpu


# ---------------------------------------------------------------------------
# Kernels
# ---------------------------------------------------------------------------

def se_fused_kernel(x_ref, w1t_ref, w2t_ref, o_ref):
    """Single-pass SE on one (bt, C, HW) block: pool -> excite -> scale."""
    inv_hw = 1.0 / x_ref.shape[-1]
    # Squeeze: global average pool over the spatial (lane) axis, f32 accumulate.
    y = jnp.sum(x_ref[...], axis=-1, dtype=jnp.float32) * inv_hw        # (bt, C)
    # Excitation: Linear -> ReLU -> Linear -> Sigmoid.  Weights are already f32
    # and already transposed to plain (K, N) layout in the wrapper, so these are
    # straight NN matmuls (no per-step cast / transpose).
    h = jnp.maximum(
        jnp.dot(y, w1t_ref[...], preferred_element_type=jnp.float32), 0.0)
    s = jnp.dot(h, w2t_ref[...], preferred_element_type=jnp.float32)
    # Gate is computed in f32 and only cast to the streaming dtype for the final
    # multiply (matches the reference to ~eps of x.dtype).
    gate = jax.nn.sigmoid(s).astype(o_ref.dtype)                         # (bt, C)
    # Scale: second explicit read of x_ref, lane-broadcast of the gate.
    o_ref[...] = x_ref[...] * gate[:, :, None]


def se_pool_kernel(x_ref, pooled_ref):
    """Two-pass fallback, pass 1: channel-tiled global average pool."""
    inv_hw = 1.0 / x_ref.shape[-1]
    pooled_ref[...] = (
        jnp.sum(x_ref[...], axis=-1, keepdims=True, dtype=jnp.float32) * inv_hw)


def se_scale_kernel(gate_ref, x_ref, o_ref):
    """Two-pass fallback, pass 2: pure streaming rescale."""
    o_ref[...] = x_ref[...] * gate_ref[...].astype(o_ref.dtype)


# ---------------------------------------------------------------------------
# Sizing helpers
# ---------------------------------------------------------------------------

def _cdiv(a, b):
    return -(-a // b)


def _vmem_budget_bytes():
    """Usable scoped-VMEM budget, generation-gated (v7x 64 MiB vs v5e/v6e 128)."""
    try:
        phys = int(pltpu.get_tpu_info().vmem_capacity_bytes)
    except Exception:
        phys = 64 << 20   # conservative (v7x-sized); safe on every generation
    # ~100 MiB usable on 128 MiB parts, ~50 MiB on 64 MiB parts.
    return (phys * 25) // 32


def _largest_divisor_leq(n, cap):
    cap = max(1, min(n, int(cap)))
    for d in range(cap, 0, -1):
        if n % d == 0:
            return d
    return 1


def _pick_bt(batch, per_batch_bytes, target_block_bytes, max_block_bytes):
    """Batch-fold factor: ~2-4 MB blocks, >= ~8 grid steps (>= 2 for tiny
    batches), and an even grid when it costs < 2x in block size (balanced
    split across v7x's two TensorCores)."""
    per = max(per_batch_bytes, 1)
    bt = max(1, min(batch, target_block_bytes // per))
    bt = min(bt, max(1, max_block_bytes // per))
    if batch >= 8:
        bt = min(bt, max(1, batch // 8))     # keep real DMA/compute overlap
    elif batch >= 2:
        bt = min(bt, max(1, batch // 2))     # at least one block per core
    for cand in range(bt, max(1, bt // 2) - 1, -1):
        if _cdiv(batch, cand) % 2 == 0:
            return cand
    return bt


def _pick_ct(C, HW, itemsize, target_bytes):
    """Channel tile for the two-pass fallback: divides C, multiple of 8."""
    budget = max(1, target_bytes // max(HW * itemsize, 1))
    if budget >= C:
        return C
    for d in range(budget, 7, -1):
        if C % d == 0 and d % 8 == 0:
            return d
    return _largest_divisor_leq(C, budget)


# ---------------------------------------------------------------------------
# Wrappers
# ---------------------------------------------------------------------------

def _se_layer_two_pass(x_flat, w1t, w2t, vmem_cap):
    """Fallback when one sample's (C, HW) slab can't be double-buffered in VMEM.
    Streams x twice (1.5x traffic) but tiles freely over channels."""
    B, C, HW = x_flat.shape
    itemsize = jnp.dtype(x_flat.dtype).itemsize
    c_t = _pick_ct(C, HW, itemsize, target_bytes=2 << 20)
    n_c = C // c_t                                   # c_t divides C
    block_bytes = c_t * HW * itemsize
    vmem_limit = int(min(vmem_cap, max(32 << 20, 6 * block_bytes + (4 << 20))))
    params = pltpu.CompilerParams(
        dimension_semantics=("parallel", "parallel"),
        vmem_limit_bytes=vmem_limit)

    # Pass 1: pool -> (B, C, 1) f32.
    pooled = pl.pallas_call(
        se_pool_kernel,
        out_shape=jax.ShapeDtypeStruct((B, C, 1), jnp.float32),
        grid_spec=pltpu.PrefetchScalarGridSpec(
            num_scalar_prefetch=0,
            grid=(B, n_c),
            in_specs=[pl.BlockSpec((1, c_t, HW), lambda b, c: (b, c, 0))],
            out_specs=pl.BlockSpec((1, c_t, 1), lambda b, c: (b, c, 0)),
        ),
        compiler_params=params,
    )(x_flat)

    # Tiny excitation (O(B*C*C_red)) left to XLA; negligible vs the two streams.
    y = pooled[:, :, 0]                                               # (B, C) f32
    h = jnp.maximum(jnp.dot(y, w1t, preferred_element_type=jnp.float32), 0.0)
    gate = jax.nn.sigmoid(
        jnp.dot(h, w2t, preferred_element_type=jnp.float32))[:, :, None]  # (B, C, 1)

    # Pass 2: scale.
    out_flat = pl.pallas_call(
        se_scale_kernel,
        out_shape=jax.ShapeDtypeStruct((B, C, HW), x_flat.dtype),
        grid_spec=pltpu.PrefetchScalarGridSpec(
            num_scalar_prefetch=0,
            grid=(B, n_c),
            in_specs=[
                pl.BlockSpec((1, c_t, 1), lambda b, c: (b, c, 0)),
                pl.BlockSpec((1, c_t, HW), lambda b, c: (b, c, 0)),
            ],
            out_specs=pl.BlockSpec((1, c_t, HW), lambda b, c: (b, c, 0)),
        ),
        compiler_params=params,
    )(gate, x_flat)
    return out_flat


def se_layer(x, w1, w2, *, target_block_bytes=3 << 20):
    """SELayer forward.
    x: (B, C, H, W) NCHW.  w1: (C_red, C), w2: (C, C_red) — the layouts of
    nn.Linear(channel, channel//reduction, bias=False).weight and its mirror."""
    B, C, H, W = x.shape
    HW = H * W
    C_red = w1.shape[0]
    assert w1.shape == (C_red, C) and w2.shape == (C, C_red)

    x_flat = x.reshape(B, C, HW)          # no transpose; spatial on the lane axis
    # Hoist per-step weight work out of the kernel: one-time f32 cast + transpose
    # to plain (K, N) layout so in-kernel matmuls are NN (no per-step vxpose).
    w1t = w1.T.astype(jnp.float32)        # (C, C_red)
    w2t = w2.T.astype(jnp.float32)        # (C_red, C)
    weight_bytes = 4 * (w1t.size + w2t.size)

    itemsize = jnp.dtype(x.dtype).itemsize
    per_batch = C * HW * itemsize

    vmem_cap = _vmem_budget_bytes()
    overhead = 2 * weight_bytes + (2 << 20)          # resident weights + headroom

    if 4 * per_batch + overhead > vmem_cap:
        # Even bt=1 cannot be double-buffered (in + out) in VMEM: stream twice.
        return _se_layer_two_pass(x_flat, w1t, w2t, vmem_cap).reshape(B, C, H, W)

    max_block_bytes = max(per_batch, (vmem_cap - overhead) // 4)
    bt = _pick_bt(B, per_batch, target_block_bytes, max_block_bytes)
    grid = _cdiv(B, bt)                   # partial last block handled by masking

    needed = 4 * bt * per_batch + overhead
    vmem_limit = int(min(vmem_cap, max(32 << 20, needed)))

    # TODO(synk): for HW not a multiple of 128 (7x7 / 14x14 late-stage SE) the
    # lane dim of these blocks is masked on store; a channels-last layout would
    # fix it but requires a real NCHW->NHWC transpose of the input first.
    # input_output_aliases={0: 0} is intentionally omitted (x is reused by the
    # caller here); it only saves footprint, not traffic.

    out_flat = pl.pallas_call(
        se_fused_kernel,
        out_shape=jax.ShapeDtypeStruct((B, C, HW), x.dtype),
        grid_spec=pltpu.PrefetchScalarGridSpec(
            num_scalar_prefetch=0,
            grid=(grid,),
            in_specs=[
                pl.BlockSpec((bt, C, HW), lambda b: (b, 0, 0)),
                pl.BlockSpec((C, C_red), lambda b: (0, 0)),
                pl.BlockSpec((C_red, C), lambda b: (0, 0)),
            ],
            out_specs=pl.BlockSpec((bt, C, HW), lambda b: (b, 0, 0)),
        ),
        compiler_params=pltpu.CompilerParams(
            dimension_semantics=("parallel",),
            vmem_limit_bytes=vmem_limit),
    )(x_flat, w1t, w2t)

    return out_flat.reshape(B, C, H, W)


def se_layer_ref(x, w1, w2):
    """Pure-JAX reference matching the PyTorch module."""
    y = jnp.mean(x, axis=(2, 3))                       # (B, C)
    y = jnp.maximum(y @ w1.T, 0.0)                     # (B, C_red)
    y = jax.nn.sigmoid(y @ w2.T)                       # (B, C)
    return x * y[:, :, None, None]


if __name__ == "__main__":
    B, C, H, W = 2, 32, 16, 16
    reduction = 16
    C_red = C // reduction

    key = jax.random.PRNGKey(0)
    kx, k1, k2 = jax.random.split(key, 3)
    x = jax.random.normal(kx, (B, C, H, W), dtype=jnp.float32)
    # nn.Linear(channel, channel//reduction, bias=False).weight -> (C_red, C)
    w1 = jax.random.normal(k1, (C_red, C), dtype=jnp.float32) * 0.1
    # nn.Linear(channel//reduction, channel, bias=False).weight -> (C, C_red)
    w2 = jax.random.normal(k2, (C, C_red), dtype=jnp.float32) * 0.1

    out = se_layer(x, w1, w2)
    jax.block_until_ready(out)

    ref = se_layer_ref(x, w1, w2)
    assert out.shape == (B, C, H, W)
    assert jnp.allclose(out, ref, atol=1e-5, rtol=1e-5)
    print("KERNEL_OK")
</pallas_src>

<mosaic_0001>
module attributes {stable_mosaic.version = 11 : i64} {
  func.func @se_fused_kernel(%arg0: i32, %arg1: memref<1x32x256xf32, #tpu.memory_space<vmem>>, %arg2: memref<32x2xf32, #tpu.memory_space<vmem>>, %arg3: memref<2x32xf32, #tpu.memory_space<vmem>>, %arg4: memref<1x32x256xf32, #tpu.memory_space<vmem>>) attributes {dimension_semantics = [#tpu.dimension_semantics<parallel>], iteration_bounds = array<i64: 2>, scalar_prefetch = 0 : i64, scratch_operands = 0 : i64, tpu.core_type = #tpu.core_type<tc>, window_params = [{transform_indices = @transform_0, window_bounds = array<i64: 1, 32, 256>}, {pipeline_mode = #tpu.pipeline_mode<synchronous>, transform_indices = @transform_1, window_bounds = array<i64: 32, 2>}, {pipeline_mode = #tpu.pipeline_mode<synchronous>, transform_indices = @transform_2, window_bounds = array<i64: 2, 32>}, {transform_indices = @transform_3, window_bounds = array<i64: 1, 32, 256>}]} {
    %c0 = arith.constant 0 : index
    %c0_0 = arith.constant 0 : index
    %c0_1 = arith.constant 0 : index
    %0 = vector.load %arg1[%c0, %c0_0, %c0_1] : memref<1x32x256xf32, #tpu.memory_space<vmem>>, vector<1x32x256xf32>
    %cst = arith.constant dense<0.000000e+00> : vector<1x32xf32>
    %1 = vector.multi_reduction <add>, %0, %cst [2] : vector<1x32x256xf32> to vector<1x32xf32>
    %cst_2 = arith.constant 3.906250e-03 : f32
    %2 = vector.broadcast %cst_2 : f32 to vector<1x32xf32>
    %3 = arith.mulf %1, %2 : vector<1x32xf32>
    %c0_3 = arith.constant 0 : index
    %c0_4 = arith.constant 0 : index
    %4 = vector.load %arg2[%c0_3, %c0_4] : memref<32x2xf32, #tpu.memory_space<vmem>>, vector<32x2xf32>
    %cst_5 = arith.constant dense<0.000000e+00> : vector<1x2xf32>
    %5 = tpu.matmul %3, %4, %cst_5 {dimension_numbers = #tpu.dot_dimension_numbers<[1], [0], [0], [1], [0, 0, 1, 1], [], []>} : vector<1x32xf32>, vector<32x2xf32>, vector<1x2xf32> -> vector<1x2xf32>
    %cst_6 = arith.constant 0.000000e+00 : f32
    %6 = vector.broadcast %cst_6 : f32 to vector<1x2xf32>
    %7 = arith.maximumf %5, %6 : vector<1x2xf32>
    %c0_7 = arith.constant 0 : index
    %c0_8 = arith.constant 0 : index
    %8 = vector.load %arg3[%c0_7, %c0_8] : memref<2x32xf32, #tpu.memory_space<vmem>>, vector<2x32xf32>
    %cst_9 = arith.constant dense<0.000000e+00> : vector<1x32xf32>
    %9 = tpu.matmul %7, %8, %cst_9 {dimension_numbers = #tpu.dot_dimension_numbers<[1], [0], [0], [1], [0, 0, 1, 1], [], []>} : vector<1x2xf32>, vector<2x32xf32>, vector<1x32xf32> -> vector<1x32xf32>
    %10 = arith.negf %9 : vector<1x32xf32>
    %11 = math.exp %10 : vector<1x32xf32>
    %cst_10 = arith.constant 1.000000e+00 : f32
    %12 = vector.broadcast %cst_10 : f32 to vector<1x32xf32>
    %13 = arith.addf %12, %11 : vector<1x32xf32>
    %14 = arith.divf %12, %13 : vector<1x32xf32>
    %c0_11 = arith.constant 0 : index
    %c0_12 = arith.constant 0 : index
    %c0_13 = arith.constant 0 : index
    %15 = vector.load %arg1[%c0_11, %c0_12, %c0_13] : memref<1x32x256xf32, #tpu.memory_space<vmem>>, vector<1x32x256xf32>
    %16 = vector.shape_cast %14 : vector<1x32xf32> to vector<1x32x1xf32>
    %17 = vector.broadcast %16 : vector<1x32x1xf32> to vector<1x32x256xf32>
    %18 = arith.mulf %15, %17 : vector<1x32x256xf32>
    %c0_14 = arith.constant 0 : index
    %c0_15 = arith.constant 0 : index
    %c0_16 = arith.constant 0 : index
    %19 = vector.load %arg4[%c0_14, %c0_15, %c0_16] : memref<1x32x256xf32, #tpu.memory_space<vmem>>, vector<1x32x256xf32>
    tpu.vector_store %arg4[%c0_14, %c0_15, %c0_16], %18 {strides = array<i32>} : memref<1x32x256xf32, #tpu.memory_space<vmem>>, vector<1x32x256xf32>,
    return
  }
  func.func @transform_0(%arg0: i32) -> (i32, i32, i32) {
    %c0_i32 = arith.constant 0 : i32
    %c0_i32_0 = arith.constant 0 : i32
    %c0_i32_1 = arith.constant 0 : i32
    return %arg0, %c0_i32, %c0_i32_0 : i32, i32, i32
  }
  func.func @transform_1(%arg0: i32) -> (i32, i32) {
    %c0_i32 = arith.constant 0 : i32
    %c0_i32_0 = arith.constant 0 : i32
    %c0_i32_1 = arith.constant 0 : i32
    return %c0_i32, %c0_i32_0 : i32, i32
  }
  func.func @transform_2(%arg0: i32) -> (i32, i32) {
    %c0_i32 = arith.constant 0 : i32
    %c0_i32_0 = arith.constant 0 : i32
    %c0_i32_1 = arith.constant 0 : i32
    return %c0_i32, %c0_i32_0 : i32, i32
  }
  func.func @transform_3(%arg0: i32) -> (i32, i32, i32) {
    %c0_i32 = arith.constant 0 : i32
    %c0_i32_0 = arith.constant 0 : i32
    %c0_i32_1 = arith.constant 0 : i32
    return %arg0, %c0_i32, %c0_i32_0 : i32, i32, i32
  }
}

</mosaic_0001>

<bundles_post_ra>
// kernel: tpu_custom_call.1
= control target key start
LH: loop header
LB: loop body
LE: loop exit
PB: predicated region body
PF: predicated region fallthrough
CT: control target
= control target key end

     0   :  { %8 = vsyncpa [#allocation3], 0  ;;  %s975_s0 = inlined_call_operand.hbm [shape: f32[2,32,256], index: 0, kind: input, shape index: {}]   ;;  %s976_s1 = inlined_call_operand.vmem [shape: f32[32,2], index: 1, kind: input, shape index: {}]   ;;  %s977_s2 = inlined_call_operand.vmem [shape: f32[2,32], index: 2, kind: input, shape index: {}]   ;;  %s978_s3 = inlined_call_operand.hbm [shape: f32[2,32,256], index: 3, kind: output, shape index: {}]  }
   0x1   :  { %10 = vsyncpa [#allocation3 + $0x1], 0 }
   0x2   :  { %11 = vsyncpa [#allocation4], 0 }
   0x3   :  { %13 = vsyncpa [#allocation4 + $0x1], 0  ;;  %s762_s12 = smov 0   ;;  %s764_s13 = smov 0  }
   0x4   :  { %s766_s14 = smov 0   ;;  %s768_s15 = smov 0  }
   0x5 LB: > { %s783_s16 = sadd.s32 4294967295, %s731_s15   ;;  %s529_s17 = sadd.s32 4294967294, %s731_s15   ;;  %s731_s15 = sphi %s768_s15, %s991_s15   ;;  %s727_s14 = sphi %s766_s14, %s990_s14   ;;  %s723_s13 = sphi %s764_s13, %s989_s13   ;;  %s719_s12 = sphi %s762_s12, %s988_s12  }
   0x6   : > { %s787_s18 = sadd.s32 1, %s731_s15   ;;  %s26_s19 = sadd.s32 1, %s727_s14 }
   0x7   : > { %s23_s20 = ssub.s32 %s731_s15, %s787_s18  ;;  %p33_p0 = scmp.ne.s32.totalorder %s727_s14, %s723_s13 }
   0x8   : > { %p24_p1 = scmp.eq.s32.totalorder %s23_s20, 0  ;;  %p34_p2 = scmp.eq.s32.totalorder %s731_s15, 0 }
   0x9   : > { %p39_p3 = scmp.ne.s32.totalorder %s723_s13, %s719_s12  ;;  %p40_p4 = scmp.eq.s32.totalorder %s783_s16, 0 }
   0xa   : > { %s799_s21 = scalar_select %p24_p1, %s727_s14, %s26_s19  }
   0xb   : > { %p801_p5 = por %p34_p2, %p33_p0  ;;  %p805_p6 = por %p40_p4, %p39_p3 }
   0xc   : > { %p105_p7 = scmp.eq.s32.totalorder %s783_s16, 1  ;;  %p111_p8 = scmp.eq.s32.totalorder %s529_s17, 1 }
   0xd   : > { %p590_p10 = scmp.lt.s32.totalorder %s731_s15, 2  ;;  %s137_s26 = sand.u32 1, %s727_s14  }
   0xe   : > { %p812_p11 = por %p105_p7, %p33_p0  ;;  %p816_p12 = por %p111_p8, %p39_p3 }
   0xf   : > { %s547_s27 = sshll.u32 %s731_s15, 10  ;;  %s532_s28 = sshll.u32 %s137_s26, 6 }
  0x10   : > { %s982_s24 = scalar_select %p812_p11, 1, 0 }
  0x11   : > { %s983_s25 = scalar_select %p816_p12, 1, 0 }
  0x12   : > { %s825_s4 = scalar_lea.hbm %s975_s0, %s547_s27  ;;  %s141_s5 = scalar_lea.vmem [#allocation2], %s532_s28 }
  0x13   : > { %s148_s6 = sshll.u32 %s141_s5, 4  ;;  %p829_p13 = pnand %p590_p10, %p801_p5  ;;  %s833_s6 = int_to_ptr.vmem [resolvable:$true] %s148_s6 }
  0x14   : > { %s835_s8 = scalar_lea.sflag [#allocation3], %s137_s26  ;;  %s635_s9 = scalar_lea.hbm %s825_s4, 1024 }
  0x15   : > { %p636_p0 = scmp.ne.s32.totalorder %s825_s4, %s635_s9  ;;  %p637_p1 = pneg %p829_p13 }
  0x16   : > { %s640_s17 = scalar_lea.hbm %s975_s0, 2048  ;;  %p641_p4 = scmp.lt.u32.totalorder %s825_s4, %s975_s0 }
  0x17   : > { %p638_p2 = pnand %p637_p1, %p636_p0  ;;  %p642_p5 = scmp.lt.u32.totalorder %s640_s17, %s635_s9 }
  0x18   : > { %p644_p8 = scmp.lt.u32.totalorder %s635_s9, %s825_s4 }
  0x19   : > { %p639_p3 = pneg %p638_p2  ;;  %p643_p7 = por %p642_p5, %p641_p4 }
  0x1b   : > { %p645_p10 = por %p644_p8, %p643_p7 }
  0x1d   : > { %p646_p9 = pnand %p645_p10, %p639_p3 }
  0x1f   : > { %649 = shalt.err (!%p646_p9)
}
  0x20   : > { %s650_s22 = scalar_lea.vmem %s833_s6, 1024  ;;  %s733_s26 = smov [#allocation2]  }
  0x21   : > { %p651_p0 = scmp.ne.s32.totalorder %s833_s6, %s650_s22  ;;  %s655_s27 = sshll.u32 %s733_s26, 4  ;;  %s656_s27 = int_to_ptr.vmem [resolvable:$false] %s655_s27 }
  0x22   : > { %s657_s28 = scalar_lea.vmem %s656_s27, 2048  ;;  %p658_p11 = scmp.lt.s32.totalorder %s833_s6, %s656_s27 }
  0x23   : > { %p653_p2 = pnand %p651_p0, %p637_p1  ;;  %p659_p4 = scmp.lt.s32.totalorder %s657_s28, %s650_s22 }
  0x25   : > { %p654_p12 = pneg %p653_p2  ;;  %p660_p5 = por %p659_p4, %p658_p11 }
  0x27   : > { %p661_p7 = pnand %p660_p5, %p654_p12 }
  0x29   : > { %664 = shalt.err (!%p661_p7)
}
  0x2a   : > { %s734_s29 = smov 256   ;;  %s735_s30 = smov 16  }
  0x2b   : > { %585 = dma.hbm_to_vmem [thread:$0]  (!%p829_p13), %s825_s4, 1024, %s833_s6, %s835_s8, %s734_s29, %s734_s29, %s735_s30  }
  0x2c   : > { %p535_p9 = scmp.ge.s32.totalorder %s731_s15, 1  ;;  %p156_p1 = scmp.lt.s32.totalorder %s731_s15, 3 }
  0x2e   : > { %p157_p3 = pnand %p535_p9, %p156_p1 }
  0x2f   : > { %s866_s5 = sand.u32 (!%p157_p3), 1, %s723_s13  }
  0x30   : > { %160 = sbr.rel (%p157_p3) target bundleno = 806 (0x326), region = 32  ;;  %s536_s9 = sshll.u32 (!%p157_p3), %s866_s5, 6 }
  0x31   : > { %s163_s10 = scalar_lea.sflag (!%p157_p3), [#allocation3], %s866_s5  ;;  %s166_s11 = scalar_lea.vmem (!%p157_p3), [#allocation2], %s536_s9 }
  0x37   : > { %710 = dma.done.wait (%p805_p6), %s163_s10, 1024  }
  0x38   : > { %712 = vsyncadd (%p805_p6), %s163_s10, 4294966272  ;;  %v876_v0 = vld [vmem:[%s166_s11] sm:$0xff]  ;;  %v878_v1 = vld [vmem:[%s166_s11 + $0x8] sm:$0xff]  ;;  %v736_v15 = vmov 0.0|0.0   ;;  %vm737_vm0 = vmmov 0   ;;  %v738_v19 = vmov 0.0   ;;  %v221_v20 = vlaneseq }
  0x39   : > { %v880_v2 = vld [vmem:[%s166_s11 + $0x20] sm:$0xff]  ;;  %v197_v3 = vadd.f32 %v878_v1, %v876_v0  ;;  %v884_v4 = vld [vmem:[%s166_s11 + $0x28] sm:$0xff]  ;;  %v886_v5 = vld [vmem:[%s166_s11 + $0x10] sm:$0xff]  ;;  %572 = vmatprep.subr.bf16.mxu0 %v736_v15  ;;  %564 = vmatprep.mubr.msk.f32.mxu0 %vm737_vm0, %v738_v19  ;;  %vm232_vm1 = vcmask 130112   ;;  %vm239_vm2 = vcmask 195712   ;;  %vm246_vm3 = vcmask 261312  }
  0x3a   : > { %v888_v6 = vld [vmem:[%s166_s11 + $0x18] sm:$0xff]  ;;  %v203_v7 = vadd.f32 %v884_v4, %v880_v2  ;;  %v892_v8 = vld [vmem:[%s166_s11 + $0x30] sm:$0xff]  ;;  %v213_v12 = vld [vmem:[%s976_s1] sm:$0xff]  ;;  %567 = vmatprep.subr.mxu1 %v738_v19  ;;  %569 = vmatprep.mubr.msk.f32.mxu1 %vm737_vm0, %v738_v19  ;;  %v222_v21 = vand.u32 127, %v221_v20  ;;  %v224_v22 = vshrl.u32 %v221_v20, 7  ;;  %vm248_vm4 = vcmask 261120  }
  0x3b   : > { %v894_v9 = vld [vmem:[%s166_s11 + $0x38] sm:$0xff]  ;;  %198 = vadd.xlane.f32.xlu0 %v197_v3  ;;  %v200_v10 = vadd.f32 %v888_v6, %v886_v5  ;;  %v214_v13 = vld [vmem:[%s976_s1 + $0x8] sm:$0xff]  ;;  %v215_v16 = vld [vmem:[%s976_s1 + $0x10] sm:$0xff]  ;;  %vm327_vm5 = vcmask 1041408   ;;  %vm323_vm6 = vcmask 15360   ;;  %s188_s27 = scalar_lea.vmem [#allocation5], %s536_s9 }
  0x3c   : > { %204 = vadd.xlane.f32.xlu1 %v203_v7  ;;  %v206_v11 = vadd.f32 %v894_v9, %v892_v8  ;;  %v573_v14 = vpack.c.bf16 %v214_v13, %v213_v12  ;;  %v216_v17 = vld [vmem:[%s976_s1 + $0x18] sm:$0xff]  ;;  %v227_v23 = vadd.s32 4294967288, %v222_v21  ;;  %v234_v25 = vadd.s32 4294967280, %v222_v21  ;;  %v322_v45 = vld [vmem:[%s977_s2] sm:$0x3]  ;;  %s456_s28 = sshll.u32 %s188_s27, 4  ;;  %s924_s28 = int_to_ptr.vmem [resolvable:$true] %s456_s28 }
  0x3d   : > { %v576_v18 = vpack.c.bf16 %v216_v17, %v215_v16  ;;  %v241_v26 = vadd.s32 4294967272, %v222_v21  ;;  %v225_v28 = vsub.s32 %v222_v21, %v224_v22  ;;  %568 = vmatpush3.msk.msra.mxu1 %vm327_vm5, %v322_v45  ;;  %v409_v54 = vsub.s32 0, %v224_v22  ;;  %s548_s29 = sshll.u32 %s783_s16, 10  ;;  %s443_s16 = scalar_lea.sflag [#allocation4], %s866_s5 }
  0x3e   : > { %574 = vmatpush3.bf16.msra.mxu0 %v573_v14  ;;  %v230_v30 = vsub.s32 %v227_v23, %v224_v22  ;;  %v237_v31 = vsub.s32 %v234_v25, %v224_v22  ;;  %s929_s10 = scalar_lea.hbm %s978_s3, %s548_s29  ;;  %s665_s11 = scalar_lea.vmem %s924_s28, 1024 }
  0x3f   : > { %201 = vadd.xlane.f32.xlu0 %v200_v10  ;;  %575 = vmatprep.subr.bf16.mxu0 %v736_v15  ;;  %v244_v34 = vsub.s32 %v241_v26, %v224_v22  ;;  %p666_p6 = scmp.ne.s32.totalorder %s924_s28, %s665_s11  ;;  %p985_p11 = scmp.ne.s32.totalorder %s982_s24, 0 }
  0x40   : > { %207 = vadd.xlane.f32.xlu1 %v206_v11  ;;  %s739_s23 = smov [#allocation5]  }
  0x41   : > { %p667_p12 = pnand %p666_p6, %p985_p11  ;;  %s669_s4 = sshll.u32 %s739_s23, 4  ;;  %s670_s4 = int_to_ptr.vmem [resolvable:$false] %s669_s4 }
  0x42   : > { %577 = vmatpush3.bf16.msra.mxu0 %v576_v18  ;;  %s671_s6 = scalar_lea.vmem %s670_s4, 2048  ;;  %p672_p8 = scmp.lt.s32.totalorder %s924_s28, %s670_s4 }
  0x43   : > { %p668_p13 = pneg %p667_p12  ;;  %p673_p10 = scmp.lt.s32.totalorder %s671_s6, %s665_s11 }
  0x45   : > { %p674_p0 = por %p673_p10, %p672_p8 }
  0x47   : > { %p675_p2 = pnand %p674_p0, %p668_p13 }
  0xc8   : > { %v199_v24 = vpop.xlane.xlu0 %198 }
  0xc9   : > { %v205_v27 = vpop.xlane.xlu1 %204  ;;  %v209_v29 = vmul.f32 0.00390625, %v199_v24 }
  0xca   : > { %v211_v32 = vmul.f32 0.00390625, %v205_v27 }
  0xcb   : > { %v226_v38 = vrot.slane %v209_v29, %v225_v28 }
  0xcc   : > { %v202_v33 = vpop.xlane.xlu0 %201  ;;  %v238_v40 = vrot.slane %v211_v32, %v237_v31 }
  0xcd   : > { %v210_v35 = vmul.f32 0.00390625, %v202_v33  ;;  %v208_v36 = vpop.xlane.xlu1 %207 }
  0xce   : > { %v212_v37 = vmul.f32 0.00390625, %v208_v36 }
  0xcf   : > { %v231_v39 = vrot.slane %v210_v35, %v230_v30 }
  0xd0   : > { %v245_v41 = vrot.slane %v212_v37, %v244_v34 }
  0xd1   : > { %v233_v42 = vsel %vm232_vm1, %v231_v39, %v226_v38 }
  0xd2   : > { %v240_v43 = vsel %vm239_vm2, %v238_v40, %v233_v42 }
  0xd3   : > { %v247_v44 = vsel %vm246_vm3, %v245_v41, %v240_v43 }
  0xd4   : > { %565 = vmatmul.mubr.msk.f32.vlgmr.msra.gmra.mrb[0].mxu0 %vm248_vm4, %v247_v44 }
 0x1a7   : > { %v317_v46 = vpop.f32.mrb[0].mxu0 }
 0x1a8   : > { %v321_v47 = vmax.f32 %v317_v46, 0.0  ;;  %v566_v48 = vpop.f32.mrb[1].mxu0 }
 0x1aa   : > { %570 = vmatmul.mubr.msk.f32.vlgmr.msra.gmra.mrb[0].mxu1 %vm323_vm6, %v321_v47 }
 0x27d   : > { %v397_v49 = vpop.f32.mrb[0].mxu1 }
 0x27e   : > { %v541_v50 = vmul.f32 -1.442695, %v397_v49  ;;  %v571_v51 = vpop.f32.mrb[1].mxu1 }
 0x280   : > { %631 = vpow2.f32 %v541_v50 }
 0x28a   : > { %v632_v52 = vpop.eup %631 }
 0x28b   : > { %v404_v53 = vadd.f32 1.0, %v632_v52 }
 0x28d   : > { %633 = vrcp.f32 %v404_v53 }
 0x297   : > { %v634_v55 = vpop.eup %633 }
 0x298   : > { %v410_v56 = vrot.slane %v634_v55, %v409_v54 }
 0x29a   : > { %416 = vbcast.lane.b32.xlu1 %v410_v56, 264  ;;  %412 = vbcast.lane.b32.xlu0 %v410_v56, 256 }
 0x29e   : > { %420 = vbcast.lane.b32.xlu1 %v410_v56, 272 }
 0x2a2   : > { %424 = vbcast.lane.b32.xlu1 %v410_v56, 280 }
 0x30c   : > { %v417_v57 = vpop.permute.xlu1 %416  ;;  %v413_v58 = vpop.permute.xlu0 %412 }
 0x30d   : > { %v428_v59 = vmul.f32 %v417_v57, %v886_v5  ;;  %v429_v60 = vmul.f32 %v417_v57, %v888_v6  ;;  %v426_v61 = vmul.f32 %v413_v58, %v876_v0  ;;  %v427_v62 = vmul.f32 %v413_v58, %v878_v1 }
 0x30f   : > { %436 = vst [vmem:[%s188_s27 + $0x10] sm:$0xff] %v428_v59  ;;  %437 = vst [vmem:[%s188_s27 + $0x18] sm:$0xff] %v429_v60 }
 0x310   : > { %434 = vst [vmem:[%s188_s27] sm:$0xff] %v426_v61  ;;  %435 = vst [vmem:[%s188_s27 + $0x8] sm:$0xff] %v427_v62  ;;  %v421_v63 = vpop.permute.xlu1 %420 }
 0x311   : > { %v430_v3 = vmul.f32 %v421_v63, %v880_v2  ;;  %v431_v5 = vmul.f32 %v421_v63, %v884_v4 }
 0x313   : > { %438 = vst [vmem:[%s188_s27 + $0x20] sm:$0xff] %v430_v3  ;;  %439 = vst [vmem:[%s188_s27 + $0x28] sm:$0xff] %v431_v5 }
 0x314   : > { %v425_v0 = vpop.permute.xlu1 %424 }
 0x315   : > { %v432_v1 = vmul.f32 %v425_v0, %v892_v8  ;;  %v433_v2 = vmul.f32 %v425_v0, %v894_v9 }
 0x317   : > { %440 = vst [vmem:[%s188_s27 + $0x30] sm:$0xff] %v432_v1  ;;  %441 = vst [vmem:[%s188_s27 + $0x38] sm:$0xff] %v433_v2 }
 0x318   : > { %678 = shalt.err (!%p675_p2)
}
 0x319   : > { %s679_s7 = scalar_lea.hbm %s929_s10, 1024  ;;  %s683_s19 = scalar_lea.hbm %s978_s3, 2048 }
 0x31a   : > { %p680_p4 = scmp.ne.s32.totalorder %s929_s10, %s679_s7  ;;  %p684_p9 = scmp.lt.u32.totalorder %s929_s10, %s978_s3 }
 0x31b   : > { %p685_p1 = scmp.lt.u32.totalorder %s683_s19, %s679_s7  ;;  %p687_p6 = scmp.lt.u32.totalorder %s679_s7, %s929_s10 }
 0x31c   : > { %p681_p5 = pnand %p680_p4, %p985_p11 }
 0x31d   : > { %p686_p3 = por %p685_p1, %p684_p9 }
 0x31e   : > { %p682_p7 = pneg %p681_p5 }
 0x31f   : > { %p688_p12 = por %p687_p6, %p686_p3 }
 0x321   : > { %p689_p13 = pnand %p688_p12, %p682_p7 }
 0x323   : > { %692 = shalt.err (!%p689_p13)
}
 0x324   : > { %s740_s26 = smov 256   ;;  %s741_s27 = smov 16  }
 0x325   : > { %580 = dma.vmem_to_hbm [thread:$0]  (%p985_p11), %s924_s28, 1024, %s929_s10, %s443_s16, %s740_s26, %s740_s26, %s741_s27  }
 0x326 PF: > { %s471_s29 = sand.u32 1, %s719_s12   ;;  %p986_p8 = scmp.ne.s32.totalorder %s983_s25, 0 }
 0x327   : > { %p987_p10 = scmp.ge.s32.totalorder %s731_s15, 2  ;;  %s472_s30 = scalar_lea.sflag [#allocation4], %s471_s29 }
 0x329   : > { %p587_p0 = pnand %p987_p10, %p986_p8 }
 0x32b   : > { %714 = dma.done.wait (!%p587_p0), %s472_s30, 1024  }
 0x32c   : > { %716 = vsyncadd (!%p587_p0), %s472_s30, 4294966272  ;;  %p16_p2 = scmp.ge.s32.totalorder %s787_s18, 4   ;;  %s988_s12 = smov %s723_s13 }
 0x32d   : > { %s989_s13 = smov %s727_s14  ;;  %s990_s14 = smov %s799_s21 }
 0x32e   : > { %s991_s15 = smov %s787_s18  ;;  %18 = sbr.rel (!%p16_p2) target bundleno = 5 (0x5), region = 77 }
 0x335   :  { %477 = vsyncpa [#allocation3], 1 }
 0x336   :  { %479 = vsyncpa [#allocation3 + $0x1], 1 }
 0x337   :  { %480 = vsyncpa [#allocation4], 1 }
 0x338   :  { %482 = vsyncpa [#allocation4 + $0x1], 1 }

</bundles_post_ra>
